<compile_context>
chip_gen: v6e
topology: v6e:2x2x1
jax: 0.10.0
libtpu: 0.0.40
codegen_flags: <defaults>
</compile_context>

<pallas_src>
import functools

import jax
import jax.numpy as jnp
from jax import lax
from jax.experimental import pallas as pl
from jax.experimental.pallas import tpu as pltpu

P = 4             # block_size (avg-pool kernel / patch size / pixel-shuffle factor)
K = 4             # top-k
TEMPERATURE = 1e-3


# ----------------------------------------------------------------------------
# Kernel 1: tiled pairwise SQUARED L2 distance between pooled target patches
# (rows) and pooled ref patches (cols).
# ----------------------------------------------------------------------------
def _cdist2_kernel(x1_ref, x2t_ref, out_ref):
    # x1_ref: (tm, c) pooled target rows; x2t_ref: (c, tn) pooled ref (transposed)
    # out_ref: (tm, tn) squared distances.
    x1 = x1_ref[...]
    x2t = x2t_ref[...]
    x1n = jnp.sum(x1 * x1, axis=-1, keepdims=True)               # (tm, 1)  lane reduce
    x2n = jnp.sum(x2t * x2t, axis=0, keepdims=True)              # (1, tn)  sublane reduce
    cross = lax.dot_general(x1, x2t, (((1,), (0,)), ((), ())),
                            precision=lax.Precision.HIGHEST,
                            preferred_element_type=jnp.float32)  # (tm, tn)
    out_ref[...] = (x1n - 2.0 * cross) + x2n


def pairwise_patch_dist2(pool_t_nc, pool_r_cn, tm, tn):
    # pool_t_nc: (b, N, C); pool_r_cn: (b, C, N)  ->  (b, N, N) squared dists
    b, n, c = pool_t_nc.shape
    return pl.pallas_call(
        _cdist2_kernel,
        out_shape=jax.ShapeDtypeStruct((b, n, n), jnp.float32),
        grid=(b, n // tm, n // tn),
        in_specs=[pl.BlockSpec((None, tm, c), lambda i, it, jt: (i, it, 0)),
                  pl.BlockSpec((None, c, tn), lambda i, it, jt: (i, 0, jt))],
        out_specs=pl.BlockSpec((None, tm, tn), lambda i, it, jt: (i, it, jt)),
        compiler_params=pltpu.CompilerParams(
            dimension_semantics=("parallel", "parallel", "parallel")),
    )(pool_t_nc, pool_r_cn)


# ----------------------------------------------------------------------------
# Kernel 2 (hot path): for a tile of TN target patches, gather the k candidate
# ref patches in-kernel (scalar-prefetched indices), compute pixel-to-candidate
# L2 distances, temperature softmax over the k*p*p candidates, and the weighted
# aggregation against the aligned candidate pixels.  Output is lane-dense rows
# of C*p*p values per patch.
# ----------------------------------------------------------------------------
def _agg_kernel(idx_ref, tgt_ref, fref_ref, faln_ref, out_ref, *,
                n, tn_patches, k, pp, c):
    # idx_ref : SMEM (b*N*k,) int32 top-k candidate indices (scalar prefetch)
    # tgt_ref : (TN, pp, c)   target patch pixels of this tile (channel-last)
    # fref_ref / faln_ref: (N, pp, c)  all ref / ref_align patches of this batch
    # out_ref : (TN, c*pp)    lane-dense output rows, layout [ch*pp + px]
    bi = pl.program_id(0)
    tile = pl.program_id(1)
    base = (bi * n + tile * tn_patches) * k

    tgt = tgt_ref[...]                                           # (TN, pp, c)

    # In-kernel gather of the k candidate patches per target patch straight
    # from the VMEM-resident per-batch patch tensors (no k-times duplicated
    # HBM intermediate).
    blk_rows, aln_rows = [], []
    for t in range(tn_patches):
        cand_r, cand_a = [], []
        for jj in range(k):
            nidx = idx_ref[base + t * k + jj]
            cand_r.append(fref_ref[nidx])                        # (pp, c)
            cand_a.append(faln_ref[nidx])
        blk_rows.append(jnp.concatenate(cand_r, axis=0))         # (M, c), M = k*pp
        aln_rows.append(jnp.concatenate(cand_a, axis=0))
    blk = jnp.stack(blk_rows, axis=0)                            # (TN, M, c)
    aln = jnp.stack(aln_rows, axis=0)                            # (TN, M, c)

    # Pixel-to-candidate squared distances, TN-batched.
    tgt2 = jnp.sum(tgt * tgt, axis=-1, keepdims=True)            # (TN, pp, 1)
    blk2 = jnp.sum(blk * blk, axis=-1)[:, None, :]               # (TN, 1, M)
    cross = lax.dot_general(tgt, blk, (((2,), (2,)), ((0,), (0,))),
                            precision=lax.Precision.HIGHEST,
                            preferred_element_type=jnp.float32)  # (TN, pp, M)
    d = jnp.sqrt(jnp.maximum(tgt2 + blk2 - 2.0 * cross, 1e-30))

    # Temperature softmax over the k*pp candidate pixels.
    logits = d * (-1.0 / TEMPERATURE)
    mx = jnp.max(logits, axis=-1, keepdims=True)
    e = jnp.exp(logits - mx)
    w = e * pl.reciprocal(jnp.sum(e, axis=-1, keepdims=True), approx=True)

    # Aggregation: out[t, ch, px] = sum_m aln[t, m, ch] * w[t, px, m]
    out = lax.dot_general(aln, w, (((1,), (2,)), ((0,), (0,))),
                          preferred_element_type=jnp.float32)    # (TN, c, pp)
    # Lane-dense store: flatten (c, pp) -> c*pp along the lane axis.
    out_ref[...] = jnp.concatenate([out[:, ch, :] for ch in range(c)], axis=-1)


def patch_aggregate(topk_idx_flat, f_tgt, f_ref, f_aln, *, k, tn_patches):
    # f_tgt / f_ref / f_aln: (b, N, pp, C) patch tensors (channel-last)
    # returns (b, N, C*pp) with row layout [ch*pp + px]
    b, n, pp, c = f_tgt.shape
    ppc = pp * c
    kernel = functools.partial(_agg_kernel, n=n, tn_patches=tn_patches,
                               k=k, pp=pp, c=c)
    grid_spec = pltpu.PrefetchScalarGridSpec(
        num_scalar_prefetch=1,
        grid=(b, n // tn_patches),
        in_specs=[pl.BlockSpec((None, tn_patches, pp, c),
                               lambda i, j, idx: (i, j, 0, 0)),
                  pl.BlockSpec((None, n, pp, c),
                               lambda i, j, idx: (i, 0, 0, 0)),
                  pl.BlockSpec((None, n, pp, c),
                               lambda i, j, idx: (i, 0, 0, 0))],
        out_specs=pl.BlockSpec((None, tn_patches, ppc),
                               lambda i, j, idx: (i, j, 0)),
    )
    return pl.pallas_call(
        kernel,
        out_shape=jax.ShapeDtypeStruct((b, n, ppc), jnp.float32),
        grid_spec=grid_spec,
        compiler_params=pltpu.CompilerParams(
            dimension_semantics=("parallel", "parallel")),
    )(topk_idx_flat, f_tgt, f_ref, f_aln)


# ----------------------------------------------------------------------------
# Plain-JAX glue: pooling, patch extraction (torch.unfold), top-k, reassembly
# (== the reshape/transpose + PixelShuffle in the module).
# ----------------------------------------------------------------------------
def _avg_pool_nc(x, p):
    # (b, C, H, W) -> (b, N, C), equals avgpool(p).flatten(2).transpose(-2,-1)
    b, c, h, w = x.shape
    xp = x.reshape(b, c, h // p, p, w // p, p).mean(axis=(3, 5))
    return xp.reshape(b, c, -1).transpose(0, 2, 1)


def _avg_pool_cn(x, p):
    # (b, C, H, W) -> (b, C, N)
    b, c, h, w = x.shape
    return x.reshape(b, c, h // p, p, w // p, p).mean(axis=(3, 5)).reshape(b, c, -1)


def _extract_patches(x, p):
    # (b, C, H, W) -> (b, N, C, p*p); patch n = ph*Wp + pw, pixel s = i*p + j
    b, c, h, w = x.shape
    hp, wp = h // p, w // p
    xr = x.reshape(b, c, hp, p, wp, p).transpose(0, 2, 4, 1, 3, 5)
    return xr.reshape(b, hp * wp, c, p * p)


def _extract_patches_t(x, p):
    # (b, C, H, W) -> (b, N, p*p, C); channel-last for in-kernel lane reductions
    b, c, h, w = x.shape
    hp, wp = h // p, w // p
    xr = x.reshape(b, c, hp, p, wp, p).transpose(0, 2, 4, 3, 5, 1)
    return xr.reshape(b, hp * wp, p * p, c)


def _assemble(out_patches, h, w, p):
    # (b, N, C, p*p) -> (b, C, H, W); equals reshape/transpose + PixelShuffle(p)
    b, n, c, pp = out_patches.shape
    hp, wp = h // p, w // p
    y = out_patches.reshape(b, hp, wp, c, p, p).transpose(0, 3, 1, 4, 2, 5)
    return y.reshape(b, c, h, w)


def _pick_tile(n, cap, align):
    if n <= cap:
        return n
    t = (cap // align) * align
    while t > align and n % t != 0:
        t -= align
    return t if (t >= align and n % t == 0) else n


def _pick_patch_tile(n, cap=32):
    # Patch tile must divide N and (when < N) be a multiple of 8 (it sits in
    # the sublane slot of the lane-dense output block); capped to keep the
    # unrolled in-kernel gather (TN*k dynamic loads) a reasonable trace size.
    if n <= cap:
        return n
    t = (cap // 8) * 8
    while t > 8 and n % t != 0:
        t -= 8
    return t if (t >= 8 and n % t == 0) else n


def non_local_block(target, ref, ref_align, p=P, k=K):
    b, c, h, w = target.shape
    n = (h // p) * (w // p)
    pp = p * p

    # --- kernel 1: pooled-patch SQUARED distances, tiled over both N axes ---
    pool_t = _avg_pool_nc(target, p)                       # (b, N, C)
    pool_r_t = _avg_pool_cn(ref, p)                        # (b, C, N)
    tm = _pick_tile(n, 512, 8)
    tn = _pick_tile(n, 512, 128)
    d2_p = pairwise_patch_dist2(pool_t, pool_r_t, tm, tn)  # (b, N, N)

    # torch.topk(D_p, k, dim=1, largest=False).indices.transpose(1, 2)
    # (identical indices on squared distances: sqrt is monotone)
    # TODO(synk): top-k selection has no clean Pallas equivalent; done with lax.top_k.
    _, topk_idx = lax.top_k(-jnp.swapaxes(d2_p, 1, 2), k)  # (b, N, k)

    # --- kernel 2: in-kernel candidate gather + softmax + aggregation -------
    f_tgt = _extract_patches_t(target, p)                  # (b, N, pp, C)
    f_ref = _extract_patches_t(ref, p)
    f_aln = _extract_patches_t(ref_align, p)

    tpatch = _pick_patch_tile(n)
    out_flat = patch_aggregate(topk_idx.reshape(-1).astype(jnp.int32),
                               f_tgt, f_ref, f_aln, k=k, tn_patches=tpatch)
    out_patches = out_flat.reshape(b, n, c, pp)            # rows are [ch*pp + px]
    return _assemble(out_patches, h, w, p)


# ----------------------------------------------------------------------------
# Pure-JAX reference (mirrors the PyTorch math directly) for a sanity check.
# ----------------------------------------------------------------------------
def non_local_block_ref(target, ref, ref_align, p=P, k=K, temperature=TEMPERATURE):
    b, c, h, w = target.shape
    n = (h // p) * (w // p)
    pool_t = _avg_pool_nc(target, p)
    pool_r = _avg_pool_nc(ref, p)
    diff = pool_t[:, :, None, :] - pool_r[:, None, :, :]
    d_p = jnp.sqrt(jnp.maximum(jnp.sum(diff * diff, axis=-1), 1e-30))   # (b, N, N)
    _, topk_idx = lax.top_k(-jnp.swapaxes(d_p, 1, 2), k)

    f_ref_align = _extract_patches(ref_align, p)
    f_ref = _extract_patches(ref, p)
    f_target = _extract_patches(target, p)
    bidx = jnp.arange(b)[:, None, None]

    def gather(f):
        g = f[bidx, topk_idx].transpose(0, 1, 3, 2, 4)
        return g.reshape(b, n, c, k * p * p)

    topk_block_align = gather(f_ref_align)
    topk_block = gather(f_ref)

    pdiff = topk_block[:, :, :, None, :] - f_target[:, :, :, :, None]   # (b,N,C,pp,M)
    d = jnp.sqrt(jnp.maximum(jnp.sum(pdiff * pdiff, axis=2), 1e-30))    # (b,N,pp,M)
    s = jax.nn.softmax(-d / temperature, axis=-1)
    out = jnp.einsum('bncm,bnsm->bncs', topk_block_align, s,
                     precision=lax.Precision.HIGHEST)
    return _assemble(out, h, w, p)


if __name__ == "__main__":
    key = jax.random.PRNGKey(0)
    k1, k2, k3 = jax.random.split(key, 3)
    b, c, h, w = 2, 4, 16, 16
    target = jax.random.normal(k1, (b, c, h, w), dtype=jnp.float32)
    ref = jax.random.normal(k2, (b, c, h, w), dtype=jnp.float32)
    ref_align = jax.random.normal(k3, (b, c, h, w), dtype=jnp.float32)

    out = jax.block_until_ready(non_local_block(target, ref, ref_align))
    ref_out = jax.block_until_ready(non_local_block_ref(target, ref, ref_align))

    assert out.shape == (b, c, h, w), out.shape
    max_err = float(jnp.max(jnp.abs(out - ref_out)))
    assert jnp.allclose(out, ref_out, atol=5e-2, rtol=1e-2), f"max_err={max_err}"
    print("KERNEL_OK")
</pallas_src>

<mosaic_0001>
module attributes {stable_mosaic.version = 11 : i64} {
  func.func @_cdist2_kernel(%arg0: i32, %arg1: i32, %arg2: i32, %arg3: memref<1x16x4xf32, #tpu.memory_space<vmem>>, %arg4: memref<1x4x16xf32, #tpu.memory_space<vmem>>, %arg5: memref<1x16x16xf32, #tpu.memory_space<vmem>>) attributes {dimension_semantics = [#tpu.dimension_semantics<parallel>, #tpu.dimension_semantics<parallel>, #tpu.dimension_semantics<parallel>], iteration_bounds = array<i64: 2, 1, 1>, scalar_prefetch = 0 : i64, scratch_operands = 0 : i64, tpu.core_type = #tpu.core_type<tc>, window_params = [{transform_indices = @transform_0, window_bounds = array<i64: 1, 16, 4>}, {transform_indices = @transform_1, window_bounds = array<i64: 1, 4, 16>}, {transform_indices = @transform_2, window_bounds = array<i64: 1, 16, 16>}]} {
    %c0 = arith.constant 0 : index
    %c0_0 = arith.constant 0 : index
    %c0_1 = arith.constant 0 : index
    %0 = vector.load %arg3[%c0, %c0_0, %c0_1] : memref<1x16x4xf32, #tpu.memory_space<vmem>>, vector<1x16x4xf32>
    %1 = vector.shape_cast %0 : vector<1x16x4xf32> to vector<16x4xf32>
    %c0_2 = arith.constant 0 : index
    %c0_3 = arith.constant 0 : index
    %c0_4 = arith.constant 0 : index
    %2 = vector.load %arg4[%c0_2, %c0_3, %c0_4] : memref<1x4x16xf32, #tpu.memory_space<vmem>>, vector<1x4x16xf32>
    %3 = vector.shape_cast %2 : vector<1x4x16xf32> to vector<4x16xf32>
    %4 = arith.mulf %1, %1 : vector<16x4xf32>
    %cst = arith.constant dense<0.000000e+00> : vector<16xf32>
    %5 = vector.multi_reduction <add>, %4, %cst [1] : vector<16x4xf32> to vector<16xf32>
    %6 = vector.shape_cast %5 : vector<16xf32> to vector<16x1xf32>
    %7 = arith.mulf %3, %3 : vector<4x16xf32>
    %cst_5 = arith.constant dense<0.000000e+00> : vector<16xf32>
    %8 = vector.multi_reduction <add>, %7, %cst_5 [0] : vector<4x16xf32> to vector<16xf32>
    %9 = vector.shape_cast %8 : vector<16xf32> to vector<1x16xf32>
    %cst_6 = arith.constant dense<0.000000e+00> : vector<16x16xf32>
    %10 = tpu.matmul %1, %3, %cst_6 {dimension_numbers = #tpu.dot_dimension_numbers<[1], [0], [0], [1], [0, 0, 1, 1], [], []>, precision = #tpu.contract_precision<fp32>} : vector<16x4xf32>, vector<4x16xf32>, vector<16x16xf32> -> vector<16x16xf32>
    %cst_7 = arith.constant 2.000000e+00 : f32
    %11 = vector.broadcast %cst_7 : f32 to vector<16x16xf32>
    %12 = arith.mulf %11, %10 : vector<16x16xf32>
    %13 = vector.broadcast %6 : vector<16x1xf32> to vector<16x16xf32>
    %14 = arith.subf %13, %12 : vector<16x16xf32>
    %15 = vector.broadcast %9 : vector<1x16xf32> to vector<16x16xf32>
    %16 = arith.addf %14, %15 : vector<16x16xf32>
    %c0_8 = arith.constant 0 : index
    %c0_9 = arith.constant 0 : index
    %c0_10 = arith.constant 0 : index
    %17 = vector.load %arg5[%c0_8, %c0_9, %c0_10] : memref<1x16x16xf32, #tpu.memory_space<vmem>>, vector<1x16x16xf32>
    %18 = vector.shape_cast %17 : vector<1x16x16xf32> to vector<16x16xf32>
    %19 = vector.shape_cast %16 : vector<16x16xf32> to vector<1x16x16xf32>
    tpu.vector_store %arg5[%c0_8, %c0_9, %c0_10], %19 {strides = array<i32>} : memref<1x16x16xf32, #tpu.memory_space<vmem>>, vector<1x16x16xf32>,
    return
  }
  func.func @transform_0(%arg0: i32, %arg1: i32, %arg2: i32) -> (i32, i32, i32) {
    %c0_i32 = arith.constant 0 : i32
    %c0_i32_0 = arith.constant 0 : i32
    return %arg0, %arg1, %c0_i32 : i32, i32, i32
  }
  func.func @transform_1(%arg0: i32, %arg1: i32, %arg2: i32) -> (i32, i32, i32) {
    %c0_i32 = arith.constant 0 : i32
    %c0_i32_0 = arith.constant 0 : i32
    return %arg0, %c0_i32, %arg2 : i32, i32, i32
  }
  func.func @transform_2(%arg0: i32, %arg1: i32, %arg2: i32) -> (i32, i32, i32) {
    %c0_i32 = arith.constant 0 : i32
    return %arg0, %arg1, %arg2 : i32, i32, i32
  }
}

</mosaic_0001>

<bundles_post_ra>
// kernel: tpu_custom_call.1
= control target key start
LH: loop header
LB: loop body
LE: loop exit
PB: predicated region body
PF: predicated region fallthrough
CT: control target
= control target key end

     0   :  { %7 = vsyncpa [#allocation3], 0  ;;  %s1196_s0 = inlined_call_operand.vmem [shape: f32[2,16,4], index: 0, kind: input, shape index: {}]   ;;  %s1197_s1 = inlined_call_operand.vmem [shape: f32[2,4,16], index: 1, kind: input, shape index: {}]   ;;  %s1198_s2 = inlined_call_operand.hbm [shape: f32[2,16,16], index: 2, kind: output, shape index: {}]  }
   0x1   :  { %9 = vsyncpa [#allocation3 + $0x1], 0  ;;  %s1071_s9 = smov 0   ;;  %s1073_s10 = smov 0  }
   0x2   :  { %s1075_s11 = smov 0   ;;  %s1077_s12 = smov 0  }
   0x3   :  { %s1079_s13 = smov 0   ;;  %s1081_s14 = smov 0  }
   0x4 LB: > { %s854_s15 = sadd.s32 4294967295, %s1051_s14   ;;  %s855_s16 = sadd.s32 4294967294, %s1051_s14   ;;  %s1051_s14 = sphi %s1081_s14, %s15_s14   ;;  %s1047_s13 = sphi %s1079_s13, %s1205_s13   ;;  %s1043_s12 = sphi %s1077_s12, %s1204_s12   ;;  %s1039_s11 = sphi %s1075_s11, %s1203_s11   ;;  %s1035_s10 = sphi %s1073_s10, %s1202_s10   ;;  %s1031_s9 = sphi %s1071_s9, %s1201_s9  }
   0x5   : > { %s34_s17 = sadd.s32 1, %s1047_s13  ;;  %s101_s18 = sadd.s32 1, %s1039_s11 }
   0x6   : > { %p36_p0 = scmp.ge.s32.totalorder %s34_s17, 2  ;;  %p111_p1 = scmp.ne.s32.totalorder %s1039_s11, %s1035_s10 }
   0x7   : > { %p112_p2 = scmp.eq.s32.totalorder %s854_s15, 1  ;;  %p117_p3 = scmp.ne.s32.totalorder %s1035_s10, %s1031_s9 }
   0x8   : > { %s1207_s17 = smov (%p36_p0, %s34_s17), 0  ;;  %p118_p5 = scmp.eq.s32.totalorder %s855_s16, 1 }
   0x9   : > { %p1111_p4 = por %p112_p2, %p111_p1  ;;  %s94_s20 = ssub.s32 %s1047_s13, %s1207_s17 }
   0xa   : > { %p858_p6 = scmp.ge.s32.totalorder %s1051_s14, 1  ;;  %p99_p7 = scmp.eq.s32.totalorder %s94_s20, 0 }
   0xb   : > { %p1118_p8 = por %p118_p5, %p117_p3  ;;  %p159_p9 = scmp.lt.s32.totalorder %s1051_s14, 3 }
   0xc   : > { %s1124_s22 = scalar_select %p99_p7, %s1039_s11, %s101_s18  }
   0xd   : > { %p160_p10 = pnand %p858_p6, %p159_p9 }
   0xe   : > { %p193_p11 = scmp.lt.s32.totalorder (!%p160_p10), %s1043_s12, 1  ;;  %s189_s4 = sand.u32 (!%p160_p10), 1, %s1035_s10  }
   0xf   : > { %163 = sbr.rel (%p160_p10) target bundleno = 265 (0x109), region = 28  ;;  %s859_s5 = sshll.u32 (!%p160_p10), %s189_s4, 4 }
  0x10   : > { %s191_s6 = scalar_lea.vmem (!%p160_p10), [#allocation2], %s859_s5  ;;  %s869_s8 = sshll.u32 (!%p160_p10), %s1043_s12, 8 }
  0x11   : > { %s756_s7 = sshll.u32 (!%p160_p10), %s191_s6, 4  ;;  %s1145_s18 = scalar_lea.hbm (!%p160_p10), %s1198_s2, %s869_s8  ;;  %s1147_s7 = int_to_ptr.vmem [resolvable:$true] %s756_s7 }
  0x12   : > { %s1151_s20 = scalar_lea.sflag (!%p160_p10), [#allocation3], %s189_s4 }
  0x14   : > { %s194_s23 = scalar_select %p193_p11, %s1043_s12, 1  ;;  %vm237_vm0 = vcmask 1043456   ;;  %vm215_vm1 = vcmask 31744   ;;  %vm223_vm2 = vcmask 125952   ;;  %vm736_vm3 = vcmask 130048  }
  0x15   : > { %s975_s12 = scalar_lea.vmem %s1147_s7, 256 }
  0x16   : > { %s862_s24 = sshll.u32 %s194_s23, 2  ;;  %s868_s25 = sshll.u32 %s194_s23, 4 }
  0x17   : > { %s208_s28 = scalar_lea.vmem %s1197_s1, %s862_s24  ;;  %s200_s3 = scalar_lea.vmem %s1196_s0, %s868_s25 }
  0x18   : > { %v212_v0 = vld [vmem:[%s208_s28] sm:$0xf]  ;;  %v211_v2 = vld [vmem:[%s200_s3 + $0x8] sm:$0xff]  ;;  %p976_p12 = scmp.ne.s32.totalorder %s1147_s7, %s975_s12  ;;  %s1053_s23 = smov [#allocation2]  }
  0x19   : > { %v210_v1 = vld [vmem:[%s200_s3] sm:$0xff]  ;;  %v239_v3 = vsel %vm237_vm0, %v212_v0, 0  ;;  %v235_v5 = vsel %vm215_vm1, %v211_v2, 0  ;;  %v214_v10 = vmul.f32 %v211_v2, %v211_v2  ;;  %v222_v25 = vmul.f32 %v212_v0, %v212_v0  ;;  %s979_s24 = sshll.u32 %s1053_s23, 4  ;;  %s980_s24 = int_to_ptr.vmem [resolvable:$false] %s979_s24 }
  0x1a   : > { %v232_v4 = vsel %vm215_vm1, %v210_v1, 0  ;;  %v213_v6 = vmul.f32 %v210_v1, %v210_v1  ;;  %v272_v7 = vand.u32 4294901760, %v239_v3  ;;  %v317_v9 = vand.u32 4294901760, %v235_v5  ;;  %p977_p13 = pnand %p976_p12, %p1111_p4  ;;  %s981_s25 = scalar_lea.vmem %s980_s24, 512 }
  0x1b   : > { %v307_v8 = vand.u32 4294901760, %v232_v4  ;;  %v219_v18 = vsel %vm215_vm1, %v214_v10, 0.0  ;;  %v224_v26 = vsel %vm223_vm2, %v222_v25, 0.0  ;;  %p982_p1 = scmp.lt.s32.totalorder %s1147_s7, %s980_s24  ;;  %p983_p2 = scmp.lt.s32.totalorder %s981_s25, %s975_s12 }
  0x1c   : > { %v216_v11 = vsel %vm215_vm1, %v213_v6, 0.0  ;;  %888 = vmatprep.subr.mxu0 %v272_v7  ;;  %v359_v13 = vsub.f32 %v239_v3, %v272_v7  ;;  %v318_v14 = vsub.f32 %v235_v5, %v317_v9  ;;  %v225_v27 = vrot.slane %v224_v26, 4  ;;  %p978_p0 = pneg %p977_p13 }
  0x1d   : > { %v308_v12 = vsub.f32 %v232_v4, %v307_v8  ;;  %895 = vmatprep.mubr.f32.mxu1 %v307_v8  ;;  %889 = vmatpush3.msra.mxu0 %v272_v7  ;;  %p984_p3 = por %p983_p2, %p982_p1 }
  0x1e   : > { %217 = vadd.xlane.f32.xlu0 %v216_v11  ;;  %v360_v16 = vand.u32 4294901760, %v359_v13  ;;  %898 = vmatprep.subr.mxu0 %v359_v13  ;;  %v319_v17 = vand.u32 4294901760, %v318_v14  ;;  %v226_v28 = vadd.f32 %v225_v27, %v224_v26 }
  0x1f   : > { %v309_v15 = vand.u32 4294901760, %v308_v12  ;;  %p985_p5 = pnand %p984_p3, %p978_p0 }
  0x20   : > { %v361_v20 = vsub.f32 %v359_v13, %v360_v16  ;;  %v320_v21 = vsub.f32 %v318_v14, %v319_v17  ;;  %v227_v31 = vrot.slane %v226_v28, 2 }
  0x21   : > { %v310_v19 = vsub.f32 %v308_v12, %v309_v15 }
  0x22   : > { %220 = vadd.xlane.f32.xlu0 %v219_v18  ;;  %v362_v23 = vand.u32 4294901760, %v361_v20  ;;  %v321_v24 = vand.u32 4294901760, %v320_v21  ;;  %v228_v39 = vadd.f32 %v227_v31, %v226_v28 }
  0x23   : > { %v311_v22 = vand.u32 4294901760, %v310_v19 }
  0x24   : > { %893 = vmatprep.subr.mxu1 %v362_v23  ;;  %v229_v49 = vrot.slane %v228_v39, 1 }
  0x25   : > { %890 = vmatprep.mubr.f32.mxu0 %v311_v22  ;;  %894 = vmatpush3.msra.mxu1 %v362_v23 }
  0x26   : > { %891 = vmatmul.mubr.f32.vlgmr.msra.gmra.mxu0 %v321_v24  ;;  %896 = vmatmul.mubr.f32.vlgmr.msra.gmra.mxu1 %v317_v9  ;;  %v230_v57 = vadd.f32 %v229_v49, %v228_v39 }
  0x27   : > { %899 = vmatpush3.msra.mxu0 %v359_v13  ;;  %903 = vmatprep.subr.mxu1 %v272_v7 }
  0x28   : > { %900 = vmatprep.mubr.f32.mxu0 %v308_v12  ;;  %904 = vmatpush3.msra.mxu1 %v272_v7 }
  0x29   : > { %908 = vmatprep.subr.mxu0 %v360_v16  ;;  %905 = vmatprep.mubr.f32.mxu1 %v309_v15 }
  0x2a   : > { %901 = vmatmul.mubr.f32.vlgmr.msra.gmra.mxu0 %v318_v14  ;;  %906 = vmatmul.mubr.f32.vlgmr.msra.gmra.mxu1 %v319_v17 }
  0x2b   : > { %909 = vmatpush3.msra.mxu0 %v360_v16  ;;  %913 = vmatprep.subr.mxu1 %v272_v7 }
  0x2c   : > { %910 = vmatprep.mubr.f32.mxu0 %v307_v8  ;;  %914 = vmatpush3.msra.mxu1 %v272_v7 }
  0x2d   : > { %915 = vmatprep.mubr.f32.mxu1 %v307_v8 }
  0x2e   : > { %911 = vmatmul.mubr.f32.vlgmr.msra.gmra.mxu0 %v317_v9  ;;  %916 = vmatmul.mubr.f32.vlgmr.msra.gmra.mxu1 %v317_v9 }
  0xa7   : > { %v218_v41 = vpop.xlane.xlu0 %217 }
  0xab   : > { %v221_v54 = vpop.xlane.xlu0 %220 }
  0xe6   : > { %v892_v29 = vpop.f32.mrf.mxu0  ;;  %v897_v30 = vpop.f32.mrf.mxu1 }
  0xe7   : > { %v406_v32 = vadd.f32 %v897_v30, %v892_v29 }
  0xe8   : > { %v313_v33 = vpop.f32.mrf.mxu0  ;;  %v399_v34 = vpop.f32.mrf.mxu1 }
  0xe9   : > { %v400_v35 = vadd.f32 %v399_v34, %v313_v33 }
  0xea   : > { %v902_v36 = vpop.f32.mrf.mxu0  ;;  %v907_v38 = vpop.f32.mrf.mxu1 }
  0xeb   : > { %v487_v37 = vadd.f32 %v902_v36, %v406_v32 }
  0xec   : > { %v479_v40 = vpop.f32.mrf.mxu0  ;;  %v560_v44 = vpop.f32.mrf.mxu1 }
  0xed   : > { %v569_v42 = vadd.f32 %v907_v38, %v487_v37  ;;  %v480_v43 = vadd.f32 %v479_v40, %v400_v35 }
  0xee   : > { %v912_v45 = vpop.f32.mrf.mxu0  ;;  %v917_v48 = vpop.f32.mrf.mxu1 }
  0xef   : > { %v561_v46 = vadd.f32 %v560_v44, %v480_v43  ;;  %v649_v47 = vadd.f32 %v912_v45, %v569_v42 }
  0xf0   : > { %v642_v50 = vpop.f32.mrf.mxu0  ;;  %v720_v53 = vpop.f32.mrf.mxu1 }
  0xf1   : > { %v727_v51 = vadd.f32 %v917_v48, %v649_v47  ;;  %v643_v52 = vadd.f32 %v642_v50, %v561_v46 }
  0xf3   : > { %v731_v55 = vmul.f32 2.0, %v727_v51  ;;  %v721_v56 = vadd.f32 %v720_v53, %v643_v52 }
  0xf5   : > { %v730_v58 = vmul.f32 2.0, %v721_v56  ;;  %v733_v59 = vsub.f32 %v221_v54, %v731_v55 }
  0xf7   : > { %v732_v60 = vsub.f32 %v218_v41, %v730_v58  ;;  %v735_v61 = vadd.f32 %v733_v59, %v230_v57 }
  0xf9   : > { %v734_v62 = vadd.f32 %v732_v60, %v230_v57  ;;  %738 = vst.msk [vmem:[%s191_s6 + $0x8] sm:$0xff] %vm736_vm3, %v735_v61 }
  0xfb   : > { %737 = vst.msk [vmem:[%s191_s6] sm:$0xff] %vm736_vm3, %v734_v62 }
  0xfc   : > { %988 = shalt.err (!%p985_p5)
}
  0xfd   : > { %s989_s26 = scalar_lea.hbm %s1145_s18, 256  ;;  %s993_s29 = scalar_lea.hbm %s1198_s2, 512 }
  0xfe   : > { %p990_p6 = scmp.ne.s32.totalorder %s1145_s18, %s989_s26  ;;  %p994_p10 = scmp.lt.s32.totalorder %s1145_s18, %s1198_s2 }
  0xff   : > { %p995_p11 = scmp.lt.s32.totalorder %s993_s29, %s989_s26 }
 0x100   : > { %p991_p7 = pnand %p990_p6, %p1111_p4 }
 0x101   : > { %p996_p12 = por %p995_p11, %p994_p10 }
 0x102   : > { %p992_p9 = pneg %p991_p7 }
 0x104   : > { %p997_p13 = pnand %p996_p12, %p992_p9 }
 0x106   : > { %1000 = shalt.err (!%p997_p13)
}
 0x107   : > { %s1054_s4 = smov 128   ;;  %s1055_s5 = smov 8  }
 0x108   : > { %918 = dma.vmem_to_hbm [thread:$0]  (%p1111_p4), %s1147_s7, 256, %s1145_s18, %s1151_s20, %s1054_s4, %s1054_s4, %s1055_s5  }
 0x109 PF: > { %p924_p0 = scmp.ge.s32.totalorder %s1051_s14, 2  ;;  %s771_s6 = sand.u32 1, %s1031_s9  }
 0x10a   : > { %s772_s8 = scalar_lea.sflag [#allocation3], %s771_s6 }
 0x10b   : > { %p921_p1 = pnand %p924_p0, %p1118_p8 }
 0x10d   : > { %p922_p2 = pneg %p921_p1 }
 0x10f   : > { %1026 = dma.done.wait (%p922_p2), %s772_s8, 256  }
 0x110   : > { %1028 = vsyncadd (%p922_p2), %s772_s8, 4294967040  ;;  %s15_s14 = sadd.s32 1, %s1051_s14   ;;  %s1201_s9 = smov %s1035_s10 }
 0x111   : > { %p12_p3 = scmp.ge.s32.totalorder %s15_s14, 4   ;;  %s1202_s10 = smov %s1039_s11 }
 0x112   : > { %s1203_s11 = smov %s1124_s22  ;;  %s1204_s12 = smov %s1047_s13 }
 0x113   : > { %s1205_s13 = smov %s1207_s17  ;;  %14 = sbr.rel (!%p12_p3) target bundleno = 4 (0x4), region = 66 }
 0x118   :  { %777 = vsyncpa [#allocation3], 1 }
 0x119   :  { %779 = vsyncpa [#allocation3 + $0x1], 1 }

</bundles_post_ra>
